<compile_context>
chip_gen: v5e
topology: v5e:2x2
jax: 0.10.0
libtpu: 0.0.40
codegen_flags: <defaults>
</compile_context>

<pallas_src>
import functools

import jax
import jax.numpy as jnp
from jax.experimental import pallas as pl
from jax.experimental.pallas import tpu as pltpu


_TARGET_STREAM_BYTES = 2 * 1024 * 1024  # aim >= ~2 MiB streamed per operand per grid step


def _vmem_budgets():
    """(vmem_limit_bytes, tile_budget_bytes) tuned per TPU generation."""
    cap = None
    try:
        cap = getattr(pltpu.get_tpu_info(), "vmem_capacity_bytes", None)
    except Exception:
        cap = None
    if not cap:
        cap = 64 * 1024 * 1024              # assume the tight case (v7x: 64 MiB)
    # v7x (64 MiB)  -> limit 48 MiB, tile budget 24 MiB
    # v5e/v6e (128) -> limit 64 MiB, tile budget 32 MiB
    limit = min((cap * 3) // 4, 64 * 1024 * 1024)
    return limit, limit // 2


def _pick_block_b(B, C, in_itemsize, tile_budget):
    """Batch-tile size: big enough to amortize per-step overhead, small enough for VMEM."""
    # Per-row VMEM cost: 2 streamed operands x 2 pipeline buffers at the input
    # dtype, plus ~4 f32 rows of in-kernel working set (x/t upcasts, exp(x-m), t*x').
    per_row = 2 * 2 * C * in_itemsize + 4 * C * 4
    max_tb = max(8, (tile_budget // per_row) // 8 * 8)
    # >= ~2 MiB streamed per operand per step (rounded up to a multiple of 8).
    target_tb = -(-_TARGET_STREAM_BYTES // (C * in_itemsize))
    target_tb = max(8, -(-target_tb // 8) * 8)
    tb = min(max_tb, target_tb)
    if B <= tb:
        return B                            # block == full array dim -> always legal
    return tb


def _balanced_softmax_kernel(x_ref, t_ref, logspc_ref, loss_ref, *,
                             block_b, total_b, mask_last):
    # x' = x + log(spc); all math in f32 even for bf16 inputs.
    x = x_ref[...].astype(jnp.float32) + logspc_ref[...].astype(jnp.float32)  # (TB, C)
    t = t_ref[...].astype(jnp.float32)                                        # (TB, C)

    def per_row_loss(xv, tv):
        # Numerically stable row-wise logsumexp; no (TB, C) logp materialized.
        m = jnp.max(xv, axis=-1, keepdims=True)                               # (TB, 1)
        lse = m + jnp.log(jnp.sum(jnp.exp(xv - m), axis=-1, keepdims=True))   # (TB, 1)
        # per-row loss = lse * sum_c(t) - sum_c(t * x')
        return (lse * jnp.sum(tv, axis=-1, keepdims=True)
                - jnp.sum(tv * xv, axis=-1, keepdims=True))

    if mask_last:
        # Pay the ragged-row mask only on the last grid step.  Masking both x
        # and t to 0 keeps lse finite and makes padded rows contribute exactly
        # 0 (those rows are also dropped by the partial output block).
        pid = pl.program_id(0)
        last = pl.num_programs(0) - 1

        @pl.when(pid != last)
        def _full_tile():
            loss_ref[...] = per_row_loss(x, t)

        @pl.when(pid == last)
        def _ragged_tile():
            row = jax.lax.broadcasted_iota(jnp.int32, x.shape, 0) + pid * block_b
            valid = row < total_b
            loss_ref[...] = per_row_loss(jnp.where(valid, x, 0.0),
                                         jnp.where(valid, t, 0.0))
    else:
        loss_ref[...] = per_row_loss(x, t)


def soft_balanced_softmax(x, target, samples_per_class, *, block_b=None):
    """x: (B, C), target: (B, C), samples_per_class: (C,). Returns scalar f32."""
    B, C = x.shape
    # Class-prior bias computed once in f32 regardless of the logits dtype.
    log_spc = jnp.log(samples_per_class.astype(jnp.float32)).reshape(1, C)

    vmem_limit, tile_budget = _vmem_budgets()
    if block_b is None:
        block_b = _pick_block_b(B, C, jnp.dtype(x.dtype).itemsize, tile_budget)
    block_b = min(block_b, B)
    num_tiles = pl.cdiv(B, block_b)
    mask_last = (B % block_b) != 0

    kernel = functools.partial(
        _balanced_softmax_kernel,
        block_b=block_b,
        total_b=B,
        mask_last=mask_last,
    )

    # Per-row losses; every grid step owns its own output block -> "parallel".
    # (Deeper input pipelining via pipeline_mode=pl.Buffered(3) is an optional
    # extra lever; default double-buffering already hides DMA at these tiles.)
    per_row = pl.pallas_call(
        kernel,
        out_shape=jax.ShapeDtypeStruct((B, 1), jnp.float32),
        grid_spec=pltpu.PrefetchScalarGridSpec(
            num_scalar_prefetch=0,
            grid=(num_tiles,),
            in_specs=[
                pl.BlockSpec((block_b, C), lambda i: (i, 0)),   # logits tile
                pl.BlockSpec((block_b, C), lambda i: (i, 0)),   # target tile
                pl.BlockSpec((1, C), lambda i: (0, 0)),         # resident log(spc)
            ],
            out_specs=pl.BlockSpec((block_b, 1), lambda i: (i, 0)),
        ),
        compiler_params=pltpu.CompilerParams(
            dimension_semantics=("parallel",),   # independent tiles -> TC sharding on v7x
            vmem_limit_bytes=vmem_limit,
        ),
    )(x, target, log_spc)

    return jnp.mean(per_row)


def soft_balanced_softmax_ref(x, target, samples_per_class):
    """Pure-JAX reference mirroring the PyTorch forward."""
    spc = samples_per_class.astype(x.dtype)[None, :]
    xs = x + jnp.log(spc)
    logp = jax.nn.log_softmax(xs, axis=-1)
    return jnp.mean(jnp.sum(-target * logp, axis=-1))


def _make_inputs(key, B, C):
    kx, kt = jax.random.split(key)
    x = jax.random.normal(kx, (B, C), dtype=jnp.float32)
    raw = jax.random.uniform(kt, (B, C), dtype=jnp.float32)
    target = raw / jnp.sum(raw, axis=-1, keepdims=True)
    samples_per_class = jnp.arange(1, C + 1, dtype=jnp.float32)
    return x, target, samples_per_class


if __name__ == "__main__":
    key = jax.random.PRNGKey(0)

    # Primary small case (matches the module's simple forward shapes).
    B, C = 8, 32
    x, target, spc = _make_inputs(key, B, C)
    loss = jax.block_until_ready(soft_balanced_softmax(x, target, spc))
    ref = soft_balanced_softmax_ref(x, target, spc)
    assert jnp.allclose(loss, ref, rtol=1e-5, atol=1e-5), (loss, ref)

    # Exercise the multi-tile "parallel" path (grid > 1, exact split).
    x2, target2, spc2 = _make_inputs(jax.random.PRNGKey(1), 40, 32)
    loss2 = jax.block_until_ready(soft_balanced_softmax(x2, target2, spc2, block_b=8))
    ref2 = soft_balanced_softmax_ref(x2, target2, spc2)
    assert jnp.allclose(loss2, ref2, rtol=1e-5, atol=1e-5), (loss2, ref2)

    # Exercise the ragged last-tile masking path (B not divisible by the tile).
    x3, target3, spc3 = _make_inputs(jax.random.PRNGKey(2), 20, 32)
    loss3 = jax.block_until_ready(soft_balanced_softmax(x3, target3, spc3, block_b=8))
    ref3 = soft_balanced_softmax_ref(x3, target3, spc3)
    assert jnp.allclose(loss3, ref3, rtol=1e-5, atol=1e-5), (loss3, ref3)

    print("KERNEL_OK")
</pallas_src>

<mosaic_0001>
module attributes {stable_mosaic.version = 11 : i64} {
  func.func @_balanced_softmax_kernel(%arg0: i32, %arg1: memref<8x32xf32, #tpu.memory_space<vmem>>, %arg2: memref<8x32xf32, #tpu.memory_space<vmem>>, %arg3: memref<1x32xf32, #tpu.memory_space<vmem>>, %arg4: memref<8x1xf32, #tpu.memory_space<vmem>>) attributes {dimension_semantics = [#tpu.dimension_semantics<parallel>], iteration_bounds = array<i64: 1>, scalar_prefetch = 0 : i64, scratch_operands = 0 : i64, tpu.core_type = #tpu.core_type<tc>, window_params = [{transform_indices = @transform_0, window_bounds = array<i64: 8, 32>}, {transform_indices = @transform_1, window_bounds = array<i64: 8, 32>}, {pipeline_mode = #tpu.pipeline_mode<synchronous>, transform_indices = @transform_2, window_bounds = array<i64: 1, 32>}, {transform_indices = @transform_3, window_bounds = array<i64: 8, 1>}]} {
    %c0 = arith.constant 0 : index
    %c0_0 = arith.constant 0 : index
    %0 = vector.load %arg1[%c0, %c0_0] : memref<8x32xf32, #tpu.memory_space<vmem>>, vector<8x32xf32>
    %c0_1 = arith.constant 0 : index
    %c0_2 = arith.constant 0 : index
    %1 = vector.load %arg3[%c0_1, %c0_2] : memref<1x32xf32, #tpu.memory_space<vmem>>, vector<1x32xf32>
    %2 = vector.broadcast %1 : vector<1x32xf32> to vector<8x32xf32>
    %3 = arith.addf %0, %2 : vector<8x32xf32>
    %c0_3 = arith.constant 0 : index
    %c0_4 = arith.constant 0 : index
    %4 = vector.load %arg2[%c0_3, %c0_4] : memref<8x32xf32, #tpu.memory_space<vmem>>, vector<8x32xf32>
    %cst = arith.constant dense<0xFF800000> : vector<8xf32>
    %5 = vector.multi_reduction <maximumf>, %3, %cst [1] : vector<8x32xf32> to vector<8xf32>
    %6 = vector.shape_cast %5 : vector<8xf32> to vector<8x1xf32>
    %7 = vector.broadcast %6 : vector<8x1xf32> to vector<8x32xf32>
    %8 = arith.subf %3, %7 : vector<8x32xf32>
    %9 = math.exp %8 : vector<8x32xf32>
    %cst_5 = arith.constant dense<0.000000e+00> : vector<8xf32>
    %10 = vector.multi_reduction <add>, %9, %cst_5 [1] : vector<8x32xf32> to vector<8xf32>
    %11 = vector.shape_cast %10 : vector<8xf32> to vector<8x1xf32>
    %12 = math.log %11 : vector<8x1xf32>
    %13 = arith.addf %6, %12 : vector<8x1xf32>
    %cst_6 = arith.constant dense<0.000000e+00> : vector<8xf32>
    %14 = vector.multi_reduction <add>, %4, %cst_6 [1] : vector<8x32xf32> to vector<8xf32>
    %15 = vector.shape_cast %14 : vector<8xf32> to vector<8x1xf32>
    %16 = arith.mulf %13, %15 : vector<8x1xf32>
    %17 = arith.mulf %4, %3 : vector<8x32xf32>
    %cst_7 = arith.constant dense<0.000000e+00> : vector<8xf32>
    %18 = vector.multi_reduction <add>, %17, %cst_7 [1] : vector<8x32xf32> to vector<8xf32>
    %19 = vector.shape_cast %18 : vector<8xf32> to vector<8x1xf32>
    %20 = arith.subf %16, %19 : vector<8x1xf32>
    %c0_8 = arith.constant 0 : index
    %c0_9 = arith.constant 0 : index
    %21 = vector.load %arg4[%c0_8, %c0_9] : memref<8x1xf32, #tpu.memory_space<vmem>>, vector<8x1xf32>
    tpu.vector_store %arg4[%c0_8, %c0_9], %20 {strides = array<i32>} : memref<8x1xf32, #tpu.memory_space<vmem>>, vector<8x1xf32>,
    return
  }
  func.func @transform_0(%arg0: i32) -> (i32, i32) {
    %c0_i32 = arith.constant 0 : i32
    %c0_i32_0 = arith.constant 0 : i32
    return %arg0, %c0_i32 : i32, i32
  }
  func.func @transform_1(%arg0: i32) -> (i32, i32) {
    %c0_i32 = arith.constant 0 : i32
    %c0_i32_0 = arith.constant 0 : i32
    return %arg0, %c0_i32 : i32, i32
  }
  func.func @transform_2(%arg0: i32) -> (i32, i32) {
    %c0_i32 = arith.constant 0 : i32
    %c0_i32_0 = arith.constant 0 : i32
    %c0_i32_1 = arith.constant 0 : i32
    return %c0_i32, %c0_i32_0 : i32, i32
  }
  func.func @transform_3(%arg0: i32) -> (i32, i32) {
    %c0_i32 = arith.constant 0 : i32
    %c0_i32_0 = arith.constant 0 : i32
    return %arg0, %c0_i32 : i32, i32
  }
}

</mosaic_0001>

<bundles_post_ra>
// kernel: tpu_custom_call.1
= control target key start
LH: loop header
LB: loop body
LE: loop exit
PB: predicated region body
PF: predicated region fallthrough
CT: control target
= control target key end

     0   :  { %8 = vsyncpa [#allocation3], 0  ;;  %s172_s0 = inlined_call_operand.hbm [shape: f32[8,32], index: 0, kind: input, shape index: {}]   ;;  %s173_s1 = inlined_call_operand.hbm [shape: f32[8,32], index: 1, kind: input, shape index: {}]   ;;  %s174_s2 = inlined_call_operand.vmem [shape: f32[1,32], index: 2, kind: input, shape index: {}]   ;;  %s175_s3 = inlined_call_operand.vmem [shape: f32[8,1], index: 3, kind: output, shape index: {}]  }
   0x1   :  { %s15_s14 = sshll.u32 %s172_s0, 4  ;;  %s16_s14 = int_to_ptr.hbm [resolvable:$true] %s15_s14 }
   0x2   :  { %9 = vsyncpa [#allocation5], 0  ;;  %s138_s15 = smov [#allocation2]   ;;  %s26_s19 = sshll.u32 %s173_s1, 4  ;;  %s27_s19 = int_to_ptr.hbm [resolvable:$true] %s26_s19 }
   0x3   :  { %s17_s16 = sshll.u32 %s138_s15, 4  ;;  %s139_s20 = smov [#allocation4]   ;;  %s18_s16 = int_to_ptr.vmem [resolvable:$true] %s17_s16 }
   0x4   :  { %20 = dma.hbm_to_vmem [thread:$0]  %s16_s14, 128, %s18_s16, [#allocation3]  }
   0x5   :  { %s28_s21 = sshll.u32 %s139_s20, 4  ;;  %s29_s21 = int_to_ptr.vmem [resolvable:$true] %s28_s21 }
   0x6   :  { %31 = dma.hbm_to_vmem [thread:$0]  %s27_s19, 128, %s29_s21, [#allocation5]  }
   0x7   :  { %134 = dma.done.wait [#allocation3], 128  }
   0x8   :  { %135 = vsyncadd [#allocation3], 4294967168 }
   0x9   :  { %136 = dma.done.wait [#allocation5], 128  }
   0xa   :  { %137 = vsyncadd [#allocation5], 4294967168  ;;  %v42_v0 = vld [vmem:[#allocation2] sm:$0xff]  ;;  %vm49_vm0 = vcmask 261120   ;;  %v48_v4 = vld [vmem:[#allocation4] sm:$0xff]  ;;  %vm71_vm1 = vcmask 7168  }
   0xb   :  { %v81_v1 = vld [vmem:[%s174_s2] ss:$0 sm:$0xff]  ;;  %v62_v5 = vsel %vm49_vm0, %v48_v4, 0.0 }
   0xc   :  { %v47_v2 = vadd.f32 %v81_v1, %v42_v0  ;;  %63 = vadd.xlane.f32.xlu1 %v62_v5 }
   0xe   :  { %v50_v3 = vsel %vm49_vm0, %v47_v2, -inf  ;;  %v66_v6 = vmul.f32 %v48_v4, %v47_v2 }
   0xf   :  { %51 = vmax.xlane.f32.xlu0 %v50_v3 }
  0x10   :  { %v67_v7 = vsel %vm49_vm0, %v66_v6, 0.0 }
  0x14   :  { %68 = vadd.xlane.f32.xlu1 %v67_v7 }
  0x7f   :  { %v64_v14 = vpop.xlane.xlu1 %63 }
  0x82   :  { %v52_v8 = vpop.xlane.xlu0 %51 }
  0x83   :  { %v53_v9 = vsub.f32 %v47_v2, %v52_v8 }
  0x85   :  { %v54_v10 = vmul.f32 1.442695, %v53_v9 }
  0x87   :  { %82 = vpow2.f32 %v54_v10  ;;  %v69_v18 = vpop.xlane.xlu1 %68 }
  0x8d   :  { %v83_v11 = vpop.eup %82 }
  0x8e   :  { %v56_v12 = vsel %vm49_vm0, %v83_v11, 0.0 }
  0x8f   :  { %57 = vadd.xlane.f32.xlu0 %v56_v12 }
 0x102   :  { %v58_v13 = vpop.xlane.xlu0 %57 }
 0x103   :  { %84 = vlog2.f32 %v58_v13 }
 0x109   :  { %v85_v15 = vpop.eup %84 }
 0x10a   :  { %v60_v16 = vmul.f32 0.6931472, %v85_v15 }
 0x10c   :  { %v61_v17 = vadd.f32 %v60_v16, %v52_v8 }
 0x10e   :  { %v65_v19 = vmul.f32 %v64_v14, %v61_v17 }
 0x110   :  { %v70_v20 = vsub.f32 %v65_v19, %v69_v18 }
 0x112   :  { %72 = vst.msk [vmem:[%s175_s3] sm:$0xff] %vm71_vm1, %v70_v20 }
 0x113   :  { %77 = vsyncpa [#allocation3], 1 }
 0x114   :  { %78 = vsyncpa [#allocation5], 1 }

</bundles_post_ra>
